<compile_context>
chip_gen: v7x
topology: tpu7x:2x2x1
jax: 0.10.0
libtpu: 0.0.40
codegen_flags: <defaults>
</compile_context>

<pallas_src>
import math

import jax
import jax.numpy as jnp
from jax.experimental import pallas as pl
from jax.experimental.pallas import tpu as pltpu


# ----------------------------------------------------------------------------
# Kernels
# ----------------------------------------------------------------------------
def sage_layer_kernel(adj_ref, h_k_ref, h_i_ref, invdeg_ref,
                      ws_ref, wn_ref, b_ref, out_ref, acc_ref):
    """One SAGEConv('mean') layer, k-tiled neighbor aggregation."""
    k = pl.program_id(1)

    @pl.when(k == 0)
    def _():
        acc_ref[...] = jnp.zeros_like(acc_ref)

    # Neighbor SUM on the MXU: bf16 0/1 mask x bf16 features, f32 accumulation.
    acc_ref[...] += jnp.dot(adj_ref[...],
                            h_k_ref[...].astype(jnp.bfloat16),
                            preferred_element_type=jnp.float32)

    @pl.when(k == pl.num_programs(1) - 1)
    def _():
        agg = acc_ref[...] * invdeg_ref[...]                      # mean (f32 scale)
        z = (jnp.dot(h_i_ref[...], ws_ref[...], preferred_element_type=jnp.float32)
             + jnp.dot(agg, wn_ref[...], preferred_element_type=jnp.float32)
             + b_ref[...])
        out_ref[...] = jnp.maximum(z, 0.0).astype(out_ref.dtype)  # ReLU


def sage_layer_head_kernel(adj_ref, h_k_ref, h_i_ref, invdeg_ref,
                           ws_ref, wn_ref, b_ref, wo_ref, bo_ref,
                           out_ref, acc_ref):
    """SAGEConv layer with the model's output_linear fused into finalize."""
    k = pl.program_id(1)

    @pl.when(k == 0)
    def _():
        acc_ref[...] = jnp.zeros_like(acc_ref)

    acc_ref[...] += jnp.dot(adj_ref[...],
                            h_k_ref[...].astype(jnp.bfloat16),
                            preferred_element_type=jnp.float32)

    @pl.when(k == pl.num_programs(1) - 1)
    def _():
        agg = acc_ref[...] * invdeg_ref[...]
        z = (jnp.dot(h_i_ref[...], ws_ref[...], preferred_element_type=jnp.float32)
             + jnp.dot(agg, wn_ref[...], preferred_element_type=jnp.float32)
             + b_ref[...])
        h2 = jnp.maximum(z, 0.0)
        out = jnp.dot(h2, wo_ref[...], preferred_element_type=jnp.float32) + bo_ref[...]
        out_ref[...] = out.astype(out_ref.dtype)


# ----------------------------------------------------------------------------
# Wrappers
# ----------------------------------------------------------------------------
def _round_up(x, m):
    return (x + m - 1) // m * m


def _pick_tile(n_pad, cap):
    t = min(cap, n_pad)
    while n_pad % t:
        t -= 128
    return t


def _pad2(x, rows, cols):
    return jnp.pad(x, ((0, rows - x.shape[0]), (0, cols - x.shape[1])))


def _sage_layer_call(adj_mask, h, inv_deg, w_self, w_neigh, b,
                     w_out=None, b_out=None, *, tm, tk):
    n_pad = adj_mask.shape[0]
    f_in = h.shape[1]
    f_hid = w_self.shape[1]
    fused = w_out is not None
    out_dim = w_out.shape[1] if fused else f_hid
    grid = (n_pad // tm, n_pad // tk)

    in_specs = [
        pl.BlockSpec((tm, tk), lambda i, k: (i, k)),        # adjacency tile (streamed)
        pl.BlockSpec((tk, f_in), lambda i, k: (k, 0)),      # h rows for aggregation
        pl.BlockSpec((tm, f_in), lambda i, k: (i, 0)),      # h rows for self term
        pl.BlockSpec((tm, 1), lambda i, k: (i, 0)),         # 1 / in_degree (f32)
        pl.BlockSpec((f_in, f_hid), lambda i, k: (0, 0)),   # W_self   (resident)
        pl.BlockSpec((f_in, f_hid), lambda i, k: (0, 0)),   # W_neigh  (resident)
        pl.BlockSpec((1, f_hid), lambda i, k: (0, 0)),      # bias     (resident)
    ]
    args = [adj_mask, h, h, inv_deg, w_self, w_neigh, b]
    kernel = sage_layer_kernel
    if fused:
        in_specs += [pl.BlockSpec((f_hid, out_dim), lambda i, k: (0, 0)),
                     pl.BlockSpec((1, out_dim), lambda i, k: (0, 0))]
        args += [w_out, b_out]
        kernel = sage_layer_head_kernel

    return pl.pallas_call(
        kernel,
        out_shape=jax.ShapeDtypeStruct((n_pad, out_dim), jnp.float32),
        grid_spec=pltpu.PrefetchScalarGridSpec(
            num_scalar_prefetch=0,
            grid=grid,
            in_specs=in_specs,
            out_specs=pl.BlockSpec((tm, out_dim), lambda i, k: (i, 0)),
            scratch_shapes=[pltpu.VMEM((tm, f_in), jnp.float32)],   # neighbor-sum acc
        ),
        compiler_params=pltpu.CompilerParams(
            dimension_semantics=("parallel", "arbitrary"),
            vmem_limit_bytes=32 * 1024 * 1024,
        ),
    )(*args)


def graphsage_forward(adj, features, params, *, tm_cap=256, tk_cap=512):
    """GraphSAGE.forward.  adj: binary [N, N] with adj[v, u] = 1 iff edge u -> v."""
    n, in_feats = features.shape
    h_feats = params["w_self1"].shape[1]
    num_classes = params["w_out"].shape[1]

    n_pad = _round_up(n, 128)
    f_in_pad = _round_up(in_feats, 128)
    f_h_pad = _round_up(h_feats, 128)
    c_pad = _round_up(num_classes, 128)

    tm = _pick_tile(n_pad, tm_cap)
    tk = _pick_tile(n_pad, tk_cap)

    # bf16 0/1 adjacency mask (exact); f32 1/deg row scale applied after the matmul.
    adj_f32 = adj.astype(jnp.float32)
    deg = jnp.sum(adj_f32, axis=1, keepdims=True)
    inv_deg = _pad2(1.0 / jnp.maximum(deg, 1.0), n_pad, 1)
    adj_mask = _pad2(adj_f32, n_pad, n_pad).astype(jnp.bfloat16)

    h0 = _pad2(features.astype(jnp.float32), n_pad, f_in_pad)

    w_self1 = _pad2(params["w_self1"], f_in_pad, f_h_pad)
    w_neigh1 = _pad2(params["w_neigh1"], f_in_pad, f_h_pad)
    b1 = _pad2(params["b1"], 1, f_h_pad)
    w_self2 = _pad2(params["w_self2"], f_h_pad, f_h_pad)
    w_neigh2 = _pad2(params["w_neigh2"], f_h_pad, f_h_pad)
    b2 = _pad2(params["b2"], 1, f_h_pad)
    w_out = _pad2(params["w_out"], f_h_pad, c_pad)
    b_out = _pad2(params["b_out"], 1, c_pad)

    # dropout_rate=0 -> nn.Identity(), so no dropout is applied.
    h1 = _sage_layer_call(adj_mask, h0, inv_deg, w_self1, w_neigh1, b1, tm=tm, tk=tk)
    out = _sage_layer_call(adj_mask, h1, inv_deg, w_self2, w_neigh2, b2,
                           w_out=w_out, b_out=b_out, tm=tm, tk=tk)
    return out[:n, :num_classes]


# ----------------------------------------------------------------------------
# Reference (pure JAX) and parameter init
# ----------------------------------------------------------------------------
def graphsage_ref(adj, features, params):
    adj = adj.astype(jnp.float32)
    inv = 1.0 / jnp.maximum(jnp.sum(adj, axis=1, keepdims=True), 1.0)
    h = features.astype(jnp.float32)
    for l in (1, 2):
        agg = (adj @ h) * inv
        h = jax.nn.relu(h @ params[f"w_self{l}"] + agg @ params[f"w_neigh{l}"]
                        + params[f"b{l}"])
    return h @ params["w_out"] + params["b_out"]


def init_params(key, in_feats, h_feats=32, num_classes=2):
    ks = jax.random.split(key, 8)

    def linear(kw, kb, fan_in, fan_out):
        bound = 1.0 / math.sqrt(fan_in)
        w = jax.random.uniform(kw, (fan_in, fan_out), jnp.float32, -bound, bound)
        b = jax.random.uniform(kb, (1, fan_out), jnp.float32, -bound, bound)
        return w, b

    w_self1, b1 = linear(ks[0], ks[1], in_feats, h_feats)
    w_neigh1, _ = linear(ks[2], ks[2], in_feats, h_feats)
    w_self2, b2 = linear(ks[3], ks[4], h_feats, h_feats)
    w_neigh2, _ = linear(ks[5], ks[5], h_feats, h_feats)
    w_out, b_out = linear(ks[6], ks[7], h_feats, num_classes)
    return dict(w_self1=w_self1, w_neigh1=w_neigh1, b1=b1,
                w_self2=w_self2, w_neigh2=w_neigh2, b2=b2,
                w_out=w_out, b_out=b_out)


if __name__ == "__main__":
    key = jax.random.PRNGKey(0)
    k_feat, k_adj, k_param = jax.random.split(key, 3)

    # Small synthetic graph (exercises padding + multi-row-tile grid: N_pad=384).
    N, in_feats, h_feats, num_classes = 300, 16, 32, 2

    features = jax.random.normal(k_feat, (N, in_feats), jnp.float32)
    # Random directed graph; adj[v, u] = 1 iff edge u -> v.
    adj = jax.random.bernoulli(k_adj, 0.05, (N, N)).astype(jnp.float32)

    params = init_params(k_param, in_feats, h_feats, num_classes)

    out = graphsage_forward(adj, features, params)
    out = jax.block_until_ready(out)
    assert out.shape == (N, num_classes)

    ref = graphsage_ref(adj, features, params)
    max_err = float(jnp.max(jnp.abs(out - ref)))
    assert max_err < 5e-2, f"max abs error vs reference: {max_err}"

    print("KERNEL_OK")
</pallas_src>

<mosaic_0001>
module attributes {stable_mosaic.version = 11 : i64} {
  func.func @sage_layer_kernel(%arg0: i32, %arg1: i32, %arg2: memref<128x384xbf16, #tpu.memory_space<vmem>>, %arg3: memref<384x128xf32, #tpu.memory_space<vmem>>, %arg4: memref<128x128xf32, #tpu.memory_space<vmem>>, %arg5: memref<128x1xf32, #tpu.memory_space<vmem>>, %arg6: memref<128x128xf32, #tpu.memory_space<vmem>>, %arg7: memref<128x128xf32, #tpu.memory_space<vmem>>, %arg8: memref<1x128xf32, #tpu.memory_space<vmem>>, %arg9: memref<128x128xf32, #tpu.memory_space<vmem>>, %arg10: memref<128x128xf32, #tpu.memory_space<vmem>>) attributes {dimension_semantics = [#tpu.dimension_semantics<parallel>, #tpu.dimension_semantics<arbitrary>], iteration_bounds = array<i64: 3, 1>, scalar_prefetch = 0 : i64, scratch_operands = 1 : i64, tpu.core_type = #tpu.core_type<tc>, window_params = [{transform_indices = @transform_0, window_bounds = array<i64: 128, 384>}, {transform_indices = @transform_1, window_bounds = array<i64: 384, 128>}, {transform_indices = @transform_2, window_bounds = array<i64: 128, 128>}, {transform_indices = @transform_3, window_bounds = array<i64: 128, 1>}, {pipeline_mode = #tpu.pipeline_mode<synchronous>, transform_indices = @transform_4, window_bounds = array<i64: 128, 128>}, {pipeline_mode = #tpu.pipeline_mode<synchronous>, transform_indices = @transform_5, window_bounds = array<i64: 128, 128>}, {pipeline_mode = #tpu.pipeline_mode<synchronous>, transform_indices = @transform_6, window_bounds = array<i64: 1, 128>}, {transform_indices = @transform_7, window_bounds = array<i64: 128, 128>}]} {
    %c0_i32 = arith.constant 0 : i32
    %0 = arith.cmpi eq, %arg1, %c0_i32 : i32
    %1 = arith.extui %0 : i1 to i32
    %c0_i32_0 = arith.constant 0 : i32
    %2 = arith.cmpi ne, %1, %c0_i32_0 : i32
    scf.if %2 {
      %cst_10 = arith.constant 0.000000e+00 : f32
      %13 = vector.broadcast %cst_10 : f32 to vector<128x128xf32>
      %c0_11 = arith.constant 0 : index
      %c0_12 = arith.constant 0 : index
      %14 = vector.load %arg10[%c0_11, %c0_12] : memref<128x128xf32, #tpu.memory_space<vmem>>, vector<128x128xf32>
      tpu.vector_store %arg10[%c0_11, %c0_12], %13 {strides = array<i32>} : memref<128x128xf32, #tpu.memory_space<vmem>>, vector<128x128xf32>,
    } else {
    }
    %c0 = arith.constant 0 : index
    %c0_1 = arith.constant 0 : index
    %3 = vector.load %arg10[%c0, %c0_1] : memref<128x128xf32, #tpu.memory_space<vmem>>, vector<128x128xf32>
    %c0_2 = arith.constant 0 : index
    %c0_3 = arith.constant 0 : index
    %4 = vector.load %arg2[%c0_2, %c0_3] : memref<128x384xbf16, #tpu.memory_space<vmem>>, vector<128x384xbf16>
    %c0_4 = arith.constant 0 : index
    %c0_5 = arith.constant 0 : index
    %5 = vector.load %arg3[%c0_4, %c0_5] : memref<384x128xf32, #tpu.memory_space<vmem>>, vector<384x128xf32>
    %6 = arith.truncf %5 : vector<384x128xf32> to vector<384x128xbf16>
    %cst = arith.constant dense<0.000000e+00> : vector<128x128xf32>
    %7 = tpu.matmul %4, %6, %cst {dimension_numbers = #tpu.dot_dimension_numbers<[1], [0], [0], [1], [0, 0, 1, 1], [], []>} : vector<128x384xbf16>, vector<384x128xbf16>, vector<128x128xf32> -> vector<128x128xf32>
    %8 = arith.addf %3, %7 : vector<128x128xf32>
    %c0_6 = arith.constant 0 : index
    %c0_7 = arith.constant 0 : index
    %9 = vector.load %arg10[%c0_6, %c0_7] : memref<128x128xf32, #tpu.memory_space<vmem>>, vector<128x128xf32>
    tpu.vector_store %arg10[%c0_6, %c0_7], %8 {strides = array<i32>} : memref<128x128xf32, #tpu.memory_space<vmem>>, vector<128x128xf32>,
    %c0_i32_8 = arith.constant 0 : i32
    %10 = arith.cmpi eq, %arg1, %c0_i32_8 : i32
    %11 = arith.extui %10 : i1 to i32
    %c0_i32_9 = arith.constant 0 : i32
    %12 = arith.cmpi ne, %11, %c0_i32_9 : i32
    scf.if %12 {
      %c0_10 = arith.constant 0 : index
      %c0_11 = arith.constant 0 : index
      %13 = vector.load %arg10[%c0_10, %c0_11] : memref<128x128xf32, #tpu.memory_space<vmem>>, vector<128x128xf32>
      %c0_12 = arith.constant 0 : index
      %c0_13 = arith.constant 0 : index
      %14 = vector.load %arg5[%c0_12, %c0_13] : memref<128x1xf32, #tpu.memory_space<vmem>>, vector<128x1xf32>
      %15 = vector.broadcast %14 : vector<128x1xf32> to vector<128x128xf32>
      %16 = arith.mulf %13, %15 : vector<128x128xf32>
      %c0_14 = arith.constant 0 : index
      %c0_15 = arith.constant 0 : index
      %17 = vector.load %arg4[%c0_14, %c0_15] : memref<128x128xf32, #tpu.memory_space<vmem>>, vector<128x128xf32>
      %c0_16 = arith.constant 0 : index
      %c0_17 = arith.constant 0 : index
      %18 = vector.load %arg6[%c0_16, %c0_17] : memref<128x128xf32, #tpu.memory_space<vmem>>, vector<128x128xf32>
      %cst_18 = arith.constant dense<0.000000e+00> : vector<128x128xf32>
      %19 = tpu.matmul %17, %18, %cst_18 {dimension_numbers = #tpu.dot_dimension_numbers<[1], [0], [0], [1], [0, 0, 1, 1], [], []>} : vector<128x128xf32>, vector<128x128xf32>, vector<128x128xf32> -> vector<128x128xf32>
      %c0_19 = arith.constant 0 : index
      %c0_20 = arith.constant 0 : index
      %20 = vector.load %arg7[%c0_19, %c0_20] : memref<128x128xf32, #tpu.memory_space<vmem>>, vector<128x128xf32>
      %cst_21 = arith.constant dense<0.000000e+00> : vector<128x128xf32>
      %21 = tpu.matmul %16, %20, %cst_21 {dimension_numbers = #tpu.dot_dimension_numbers<[1], [0], [0], [1], [0, 0, 1, 1], [], []>} : vector<128x128xf32>, vector<128x128xf32>, vector<128x128xf32> -> vector<128x128xf32>
      %22 = arith.addf %19, %21 : vector<128x128xf32>
      %c0_22 = arith.constant 0 : index
      %c0_23 = arith.constant 0 : index
      %23 = vector.load %arg8[%c0_22, %c0_23] : memref<1x128xf32, #tpu.memory_space<vmem>>, vector<1x128xf32>
      %24 = vector.broadcast %23 : vector<1x128xf32> to vector<128x128xf32>
      %25 = arith.addf %22, %24 : vector<128x128xf32>
      %cst_24 = arith.constant 0.000000e+00 : f32
      %26 = vector.broadcast %cst_24 : f32 to vector<128x128xf32>
      %27 = arith.maximumf %25, %26 : vector<128x128xf32>
      %c0_25 = arith.constant 0 : index
      %c0_26 = arith.constant 0 : index
      %28 = vector.load %arg9[%c0_25, %c0_26] : memref<128x128xf32, #tpu.memory_space<vmem>>, vector<128x128xf32>
      tpu.vector_store %arg9[%c0_25, %c0_26], %27 {strides = array<i32>} : memref<128x128xf32, #tpu.memory_space<vmem>>, vector<128x128xf32>,
    } else {
    }
    return
  }
  func.func @transform_0(%arg0: i32, %arg1: i32) -> (i32, i32) {
    %c0_i32 = arith.constant 0 : i32
    return %arg0, %arg1 : i32, i32
  }
  func.func @transform_1(%arg0: i32, %arg1: i32) -> (i32, i32) {
    %c0_i32 = arith.constant 0 : i32
    %c0_i32_0 = arith.constant 0 : i32
    return %arg1, %c0_i32 : i32, i32
  }
  func.func @transform_2(%arg0: i32, %arg1: i32) -> (i32, i32) {
    %c0_i32 = arith.constant 0 : i32
    %c0_i32_0 = arith.constant 0 : i32
    return %arg0, %c0_i32 : i32, i32
  }
  func.func @transform_3(%arg0: i32, %arg1: i32) -> (i32, i32) {
    %c0_i32 = arith.constant 0 : i32
    %c0_i32_0 = arith.constant 0 : i32
    return %arg0, %c0_i32 : i32, i32
  }
  func.func @transform_4(%arg0: i32, %arg1: i32) -> (i32, i32) {
    %c0_i32 = arith.constant 0 : i32
    %c0_i32_0 = arith.constant 0 : i32
    %c0_i32_1 = arith.constant 0 : i32
    return %c0_i32, %c0_i32_0 : i32, i32
  }
  func.func @transform_5(%arg0: i32, %arg1: i32) -> (i32, i32) {
    %c0_i32 = arith.constant 0 : i32
    %c0_i32_0 = arith.constant 0 : i32
    %c0_i32_1 = arith.constant 0 : i32
    return %c0_i32, %c0_i32_0 : i32, i32
  }
  func.func @transform_6(%arg0: i32, %arg1: i32) -> (i32, i32) {
    %c0_i32 = arith.constant 0 : i32
    %c0_i32_0 = arith.constant 0 : i32
    %c0_i32_1 = arith.constant 0 : i32
    return %c0_i32, %c0_i32_0 : i32, i32
  }
  func.func @transform_7(%arg0: i32, %arg1: i32) -> (i32, i32) {
    %c0_i32 = arith.constant 0 : i32
    %c0_i32_0 = arith.constant 0 : i32
    return %arg0, %c0_i32 : i32, i32
  }
}

</mosaic_0001>

<bundles_post_ra>
// kernel: tpu_custom_call.1
= control target key start
LH: loop header
LB: loop body
LE: loop exit
PB: predicated region body
PF: predicated region fallthrough
CT: control target
= control target key end

     0   :  { %s3058_s0 = inlined_call_operand.hbm [shape: bf16[384,384], index: 0, kind: input, shape index: {}]   ;;  %s3059_s1 = inlined_call_operand.vmem [shape: f32[384,128], index: 1, kind: input, shape index: {}]   ;;  %s3060_s2 = inlined_call_operand.hbm [shape: f32[384,128], index: 2, kind: input, shape index: {}]   ;;  %s3061_s3 = inlined_call_operand.vmem [shape: f32[384,1], index: 3, kind: input, shape index: {}]   ;;  %s3062_s4 = inlined_call_operand.hbm [shape: f32[128,128], index: 4, kind: input, shape index: {}]   ;;  %s3063_s5 = inlined_call_operand.hbm [shape: f32[128,128], index: 5, kind: input, shape index: {}]   ;;  %s3064_s6 = inlined_call_operand.vmem [shape: f32[1,128], index: 6, kind: input, shape index: {}]   ;;  %s3065_s7 = inlined_call_operand.hbm [shape: f32[384,128], index: 7, kind: output, shape index: {}]  }
   0x1   :  { %3074 = sst [smem:[#allocation21_spill]] %s3058_s0 }
   0x2   :  { %3075 = sst [smem:[#allocation22_spill]] %s3062_s4 }
   0x3   :  { %3076 = sst [smem:[#allocation23_spill]] %s3063_s5 }
   0x4   :  { %12 = vsyncpa [#allocation4], 0 }
   0x5   :  { %14 = vsyncpa [#allocation4 + $0x1], 0 }
   0x6   :  { %15 = vsyncpa [#allocation7], 0 }
   0x7   :  { %17 = vsyncpa [#allocation7 + $0x1], 0 }
   0x8   :  { %18 = vsyncpa [#allocation10], 0 }
   0x9   :  { %19 = vsyncpa [#allocation5], 0 }
   0xa   :  { %21 = vsyncpa [#allocation5 + $0x1], 0  ;;  %s2449_s24 = smov 0   ;;  %s2451_s25 = smov 0  }
   0xb   :  { %s2453_s26 = smov 0   ;;  %s2455_s27 = smov 0  }
   0xc   :  { %s2457_s28 = smov 0   ;;  %s2459_s29 = smov 0  }
   0xd LB: > { %3077 = sst [smem:[#allocation17_spill]] %s2383_s26  ;;  %s2480_s30 = sadd.s32 4294967295, %s2395_s29   ;;  %s2395_s29 = sphi %s2459_s29, %s27_s29   ;;  %s2391_s28 = sphi %s2457_s28, %s3107_s28   ;;  %s2387_s27 = sphi %s2455_s27, %s3106_s27   ;;  %s2383_s26 = sphi %s2453_s26, %s3102_s26   ;;  %s2379_s25 = sphi %s2451_s25, %s3105_s25   ;;  %s2375_s24 = sphi %s2449_s24, %s3104_s24  }
   0xe   : > { %s1618_s8 = sadd.s32 4294967294, %s2395_s29   ;;  %p61_p0 = scmp.ne.s32.totalorder %s2379_s25, %s2375_s24 }
   0xf   : > { %p3066_p1 = scmp.eq.s32.totalorder %s2480_s30, 0  ;;  %p232_p3 = scmp.eq.s32.totalorder %s1618_s8, 2 }
  0x10   : > { %p1619_p5 = scmp.ge.s32.totalorder %s2395_s29, 1  ;;  %p239_p7 = scmp.lt.s32.totalorder %s2395_s29, 4 }
  0x11   : > { %p2489_p4 = por %p3066_p1, %p61_p0  ;;  %p2494_p6 = por %p232_p3, %p61_p0 }
  0x12   : > { %p2499_p8 = pnand %p1619_p5, %p239_p7  ;;  %s2397_s12 = smov [#allocation8]  }
  0x13   : > { %s3078_s9 = scalar_select %p2489_p4, 1, 0 }
  0x14   : > { %s3079_s10 = scalar_select %p2494_p6, 1, 0 }
  0x15   : > { %s3081_s11 = scalar_select %p2499_p8, 1, 0 }
  0x16   : > { %3080 = sst [smem:[#allocation18_spill]] %s3079_s10  ;;  %s260_s13 = sshll.u32 %s2397_s12, 4  ;;  %s261_s13 = int_to_ptr.vmem [resolvable:$true] %s260_s13 }
  0x17   : > { %p2070_p9 = pneg %p2499_p8  ;;  %s2398_s15 = smov [#allocation9]  }
  0x18   : > { %s273_s16 = sshll.u32 %s2398_s15, 4  ;;  %s3083_s4 = sld [smem:[#allocation22_spill]]  ;;  %s2511_s16 = int_to_ptr.vmem [resolvable:$true] %s273_s16 }
  0x19   : > { %p2507_p10 = pnand %p2070_p9, %p3066_p1 }
  0x1b   : > { %p2187_p12 = pneg %p2507_p10 }
  0x1e   : > { %s2185_s19 = scalar_lea.hbm %s3083_s4, 2048 }
  0x1f   : > { %p2186_p11 = scmp.ne.s32.totalorder %s3083_s4, %s2185_s19  ;;  %p2192_p3 = scmp.lt.u32.totalorder %s2185_s19, %s3083_s4 }
  0x21   : > { %p2188_p13 = pnand %p2187_p12, %p2186_p11 }
  0x23   : > { %p2189_p0 = pneg %p2188_p13 }
  0x25   : > { %p2194_p5 = pnand %p2192_p3, %p2189_p0 }
  0x27   : > { %2197 = shalt.err (!%p2194_p5)
}
  0x28   : > { %s2198_s8 = scalar_lea.vmem %s261_s13, 2048  ;;  %p2206_p2 = scmp.lt.s32.totalorder %s261_s13, %s261_s13 }
  0x29   : > { %p2199_p7 = scmp.ne.s32.totalorder %s261_s13, %s2198_s8  ;;  %p2207_p6 = scmp.lt.s32.totalorder %s2198_s8, %s2198_s8 }
  0x2b   : > { %p2201_p9 = pnand %p2199_p7, %p2187_p12  ;;  %p2208_p4 = por %p2207_p6, %p2206_p2 }
  0x2d   : > { %p2202_p1 = pneg %p2201_p9 }
  0x2f   : > { %p2209_p8 = pnand %p2208_p4, %p2202_p1 }
  0x31   : > { %2212 = shalt.err (!%p2209_p8)
}
  0x32   : > { %s3070_s12 = smov 128   ;;  %s3071_s15 = smov 8  }
  0x33   : > { %2073 = dma.hbm_to_vmem [thread:$0]  (!%p2507_p10), %s3083_s4, 2048, %s261_s13, [#allocation7], %s3070_s12, %s3070_s12, %s3071_s15  }
  0x34   : > { %s3084_s5 = sld [smem:[#allocation23_spill]] }
  0x3a   : > { %s2213_s21 = scalar_lea.hbm %s3084_s5, 2048 }
  0x3b   : > { %p2214_p1 = scmp.ne.s32.totalorder %s3084_s5, %s2213_s21  ;;  %p2220_p6 = scmp.lt.u32.totalorder %s2213_s21, %s3084_s5 }
  0x3d   : > { %p2216_p2 = pnand %p2214_p1, %p2187_p12 }
  0x3f   : > { %p2217_p4 = pneg %p2216_p2 }
  0x41   : > { %p2222_p8 = pnand %p2220_p6, %p2217_p4 }
  0x43   : > { %2225 = shalt.err (!%p2222_p8)
}
  0x44   : > { %s2226_s13 = scalar_lea.vmem %s2511_s16, 2048  ;;  %p2234_p3 = scmp.lt.s32.totalorder %s2511_s16, %s2511_s16 }
  0x45   : > { %p2227_p11 = scmp.ne.s32.totalorder %s2511_s16, %s2226_s13  ;;  %p2235_p5 = scmp.lt.s32.totalorder %s2226_s13, %s2226_s13 }
  0x47   : > { %p2229_p13 = pnand %p2227_p11, %p2187_p12  ;;  %p2236_p7 = por %p2235_p5, %p2234_p3 }
  0x49   : > { %p2230_p0 = pneg %p2229_p13 }
  0x4b   : > { %p2237_p9 = pnand %p2236_p7, %p2230_p0 }
  0x4d   : > { %2240 = shalt.err (!%p2237_p9)
}
  0x4e   : > { %2076 = dma.hbm_to_vmem [thread:$0]  (!%p2507_p10), %s3084_s5, 2048, %s2511_s16, [#allocation10], %s3070_s12, %s3070_s12, %s3071_s15  }
  0x4f   : > { %s39_s14 = sadd.s32 1, %s2391_s28  ;;  %s48_s18 = sadd.s32 1, %s2383_s26 }
  0x50   : > { %p41_p12 = scmp.ge.s32.totalorder %s39_s14, 3  ;;  %p55_p1 = scmp.ne.s32.totalorder %s2383_s26, %s2379_s25 }
  0x51   : > { %p56_p2 = scmp.eq.s32.totalorder %s2395_s29, 0  ;;  %p2090_p4 = scmp.lt.s32.totalorder %s2395_s29, 3 }
  0x52   : > { %s3109_s14 = smov (%p41_p12, %s39_s14), 0  ;;  %p3086_p8 = scmp.eq.s32.totalorder %s2480_s30, 2 }
  0x53   : > { %3085 = sst [smem:[#allocation19_spill]] %s3109_s14  ;;  %p57_p6 = por %p56_p2, %p55_p1 }
  0x54   : > { %p2576_p11 = por %p3086_p8, %p55_p1  ;;  %s43_s20 = ssub.s32 %s2391_s28, %s3109_s14 }
  0x55   : > { %s2583_s21 = sand.u32 1, %s2383_s26   ;;  %p46_p10 = scmp.eq.s32.totalorder %s43_s20, 0 }
  0x56   : > { %s2053_s16 = smul.u32 192, %s2583_s21  ;;  %p2586_p13 = pnand %p2090_p4, %p57_p6 }
  0x57   : > { %s2591_s23 = scalar_select %p46_p10, %s2383_s26, %s48_s18  }
  0x58   : > { %s2054_s8 = smul.u32 3072, %s2391_s28  ;;  %s294_s13 = scalar_lea.vmem [#allocation3], %s2053_s16 }
  0x59   : > { %3089 = sst [smem:[#allocation20_spill]] %s2591_s23  ;;  %s304_s10 = sshll.u32 %s294_s13, 4  ;;  %s2599_s10 = int_to_ptr.vmem [resolvable:$true] %s304_s10 }
  0x5a   : > { %s3090_s0 = sld [smem:[#allocation21_spill]]  ;;  %s291_s20 = scalar_lea.sflag [#allocation4], %s2583_s21 }
  0x5b   : > { %p2243_p3 = pneg %p2586_p13 }
  0x60   : > { %s2597_s15 = scalar_lea.hbm %s3090_s0, %s2054_s8  ;;  %s2246_s12 = scalar_lea.hbm %s3090_s0, 9216 }
  0x61   : > { %s2241_s4 = scalar_lea.hbm %s2597_s15, 3072  ;;  %p2247_p9 = scmp.lt.u32.totalorder %s2597_s15, %s3090_s0 }
  0x62   : > { %p2242_p0 = scmp.ne.s32.totalorder %s2597_s15, %s2241_s4  ;;  %p2248_p12 = scmp.lt.u32.totalorder %s2246_s12, %s2241_s4 }
  0x63   : > { %p2250_p2 = scmp.lt.u32.totalorder %s2241_s4, %s2597_s15 }
  0x64   : > { %p2244_p5 = pnand %p2243_p3, %p2242_p0  ;;  %p2249_p1 = por %p2248_p12, %p2247_p9 }
  0x66   : > { %p2245_p7 = pneg %p2244_p5  ;;  %p2251_p4 = por %p2250_p2, %p2249_p1 }
  0x68   : > { %p2252_p6 = pnand %p2251_p4, %p2245_p7 }
  0x6a   : > { %2255 = shalt.err (!%p2252_p6)
}
  0x6b   : > { %s2256_s17 = scalar_lea.vmem %s2599_s10, 3072  ;;  %s2401_s18 = smov [#allocation3]  }
  0x6c   : > { %p2257_p8 = scmp.ne.s32.totalorder %s2599_s10, %s2256_s17  ;;  %s2261_s16 = sshll.u32 %s2401_s18, 4  ;;  %s2262_s16 = int_to_ptr.vmem [resolvable:$false] %s2261_s16 }
  0x6d   : > { %s2263_s8 = scalar_lea.vmem %s2262_s16, 6144  ;;  %p2264_p5 = scmp.lt.s32.totalorder %s2599_s10, %s2262_s16 }
  0x6e   : > { %p2259_p10 = pnand %p2257_p8, %p2243_p3  ;;  %p2265_p9 = scmp.lt.s32.totalorder %s2263_s8, %s2256_s17 }
  0x70   : > { %p2260_p0 = pneg %p2259_p10  ;;  %p2266_p12 = por %p2265_p9, %p2264_p5 }
  0x72   : > { %p2267_p1 = pnand %p2266_p12, %p2260_p0 }
  0x74   : > { %2270 = shalt.err (!%p2267_p1)
}
  0x75   : > { %s2402_s4 = smov 192   ;;  %s2403_s12 = smov 12  }
  0x76   : > { %2080 = dma.hbm_to_vmem [thread:$0]  (!%p2586_p13), %s2597_s15, 3072, %s2599_s10, %s291_s20, %s2402_s4, %s2402_s4, %s2403_s12  }
  0x77   : > { %s314_s13 = sand.u32 1, %s2395_s29   ;;  %s1627_s18 = sshll.u32 %s2583_s21, 7 }
  0x78   : > { %s1667_s16 = sshll.u32 %s2391_s28, 11  ;;  %s318_s17 = scalar_lea.vmem [#allocation6], %s1627_s18 }
  0x79   : > { %s325_s8 = sshll.u32 %s318_s17, 4  ;;  %s2635_s14 = scalar_lea.hbm %s3060_s2, %s1667_s16  ;;  %s2637_s8 = int_to_ptr.vmem [resolvable:$true] %s325_s8 }
  0x7a   : > { %s2639_s23 = scalar_lea.sflag [#allocation7], %s314_s13  ;;  %s2271_s26 = scalar_lea.hbm %s2635_s14, 2048 }
  0x7b   : > { %p2272_p7 = scmp.ne.s32.totalorder %s2635_s14, %s2271_s26  ;;  %s2276_s0 = scalar_lea.hbm %s3060_s2, 6144 }
  0x7c   : > { %p2277_p6 = scmp.lt.u32.totalorder %s2635_s14, %s3060_s2  ;;  %p2278_p8 = scmp.lt.u32.totalorder %s2276_s0, %s2271_s26 }
  0x7d   : > { %p2274_p2 = pnand %p2272_p7, %p2243_p3  ;;  %p2280_p0 = scmp.lt.u32.totalorder %s2271_s26, %s2635_s14 }
  0x7e   : > { %p2279_p10 = por %p2278_p8, %p2277_p6 }
  0x7f   : > { %p2275_p4 = pneg %p2274_p2 }
  0x80   : > { %p2281_p5 = por %p2280_p0, %p2279_p10 }
  0x82   : > { %p2282_p9 = pnand %p2281_p5, %p2275_p4 }
  0x84   : > { %2285 = shalt.err (!%p2282_p9)
}
  0x85   : > { %s2286_s20 = scalar_lea.vmem %s2637_s8, 2048  ;;  %s2404_s4 = smov [#allocation6]  }
  0x86   : > { %p2287_p12 = scmp.ne.s32.totalorder %s2637_s8, %s2286_s20  ;;  %s2291_s12 = sshll.u32 %s2404_s4, 4  ;;  %s2292_s12 = int_to_ptr.vmem [resolvable:$false] %s2291_s12 }
  0x87   : > { %s2293_s13 = scalar_lea.vmem %s2292_s12, 4096  ;;  %p2294_p2 = scmp.lt.s32.totalorder %s2637_s8, %s2292_s12 }
  0x88   : > { %p2289_p1 = pnand %p2287_p12, %p2243_p3  ;;  %p2295_p6 = scmp.lt.s32.totalorder %s2293_s13, %s2286_s20 }
  0x8a   : > { %p2290_p7 = pneg %p2289_p1  ;;  %p2296_p8 = por %p2295_p6, %p2294_p2 }
  0x8c   : > { %p2297_p10 = pnand %p2296_p8, %p2290_p7 }
  0x8e   : > { %2300 = shalt.err (!%p2297_p10)
}
  0x8f   : > { %s3091_s26 = smov 8   ;;  %s3092_s18 = smov 128  }
  0x90   : > { %2083 = dma.hbm_to_vmem [thread:$0]  (!%p2586_p13), %s2635_s14, 2048, %s2637_s8, %s2639_s23, %s3092_s18, %s3092_s18, %s3091_s26  }
  0x91   : > { %p3093_p3 = scmp.ne.s32.totalorder %s3081_s11, 0 }
  0x92   : > { %s2671_s16 = sand.u32 (!%p3093_p3), 1, %s2379_s25   ;;  %p3094_p4 = scmp.ne.s32.totalorder (!%p3093_p3), %s3078_s9, 0 }
  0x93   : > { %346 = sbr.rel (%p3093_p3) target bundleno = 725 (0x2d5), region = 48  ;;  %s349_s15 = scalar_lea.sflag (!%p3093_p3), [#allocation4], %s2671_s16 }
  0x94   : > { %s2055_s17 = smul.u32 (!%p3093_p3), 192, %s2671_s16 }
  0x96   : > { %s2675_s21 = scalar_lea.vmem (!%p3093_p3), [#allocation3], %s2055_s17 }
  0x9a   : > { %2354 = dma.done.wait (%p3094_p4), %s349_s15, 3072  }
  0x9b   : > { %2356 = vsyncadd (%p3094_p4), %s349_s15, 4294964224  ;;  %s357_s11 = sand.u32 1, %s2480_s30   ;;  %s1631_s14 = sshll.u32 %s2671_s16, 7 }
  0x9c   : > { %s358_s22 = scalar_lea.sflag [#allocation7], %s357_s11  ;;  %s2685_s23 = scalar_lea.vmem [#allocation6], %s1631_s14 }
  0x9d   : > { %2358 = dma.done.wait (%p3094_p4), %s358_s22, 2048  }
  0x9e   : > { %2360 = vsyncadd (%p3094_p4), %s358_s22, 4294965248  ;;  %p3095_p13 = scmp.eq.s32.totalorder %s2480_s30, 0 }
  0xa0   : > { %2362 = dma.done.wait (%p3095_p13), [#allocation7], 2048   ;;  %p3096_p0 = pmov %p3095_p13 }
  0xa2   : > { %2364 = vsyncadd (%p3096_p0), [#allocation7], 4294965248  ;;  %p3097_p5 = pmov %p3096_p0 }
  0xa3   : > { %p3098_p9 = pmov %p3096_p0 }
  0xa4   : > { %2366 = dma.done.wait (%p3097_p5), [#allocation10], 2048  }
  0xa5   : > { %2368 = vsyncadd (%p3098_p9), [#allocation10], 4294965248  ;;  %v2405_v0 = vmov 0   ;;  %v516_v1 = vld [vmem:[%s3059_s1 + $0x80] sm:$0xff]  ;;  %v517_v2 = vld [vmem:[%s3059_s1 + $0x88] sm:$0xff]  ;;  %s1635_s17 = sshll.u32 %s2387_s27, 4 }
  0xa6   : > { %2151 = vset.pattern.permute.xlu0 %v2405_v0  ;;  %2152 = vset.pattern.permute.xlu1 %v2405_v0  ;;  %v500_v3 = vld [vmem:[%s3059_s1] sm:$0xff]  ;;  %v556_v4 = vpack.c.bf16 %v517_v2, %v516_v1  ;;  %v501_v5 = vld [vmem:[%s3059_s1 + $0x8] sm:$0xff]  ;;  %v518_v10 = vld [vmem:[%s3059_s1 + $0x90] sm:$0xff]  ;;  %p425_p12 = scmp.lt.s32.totalorder %s1635_s17, 47  ;;  %s2406_s18 = smov [#allocation11]  }
  0xa7   : > { %v532_v6 = vld [vmem:[%s3059_s1 + $0x100] sm:$0xff]  ;;  %v533_v7 = vld [vmem:[%s3059_s1 + $0x108] sm:$0xff]  ;;  %v548_v8 = vpack.c.bf16 %v501_v5, %v500_v3  ;;  %v519_v11 = vld [vmem:[%s3059_s1 + $0x98] sm:$0xff]  ;;  %s2305_s15 = sshll.u32 %s2406_s18, 4  ;;  %s2306_s15 = int_to_ptr.vmem [resolvable:$false] %s2305_s15 }
  0xa8   : > { %v564_v9 = vpack.c.bf16 %v533_v7, %v532_v6  ;;  %v502_v12 = vld [vmem:[%s3059_s1 + $0x10] sm:$0xff]  ;;  %1669 = vmatprep.subr.bf16.mxu0 %v556_v4  ;;  %v557_v13 = vpack.c.bf16 %v519_v11, %v518_v10  ;;  %v503_v14 = vld [vmem:[%s3059_s1 + $0x18] sm:$0xff]  ;;  %v520_v19 = vld [vmem:[%s3059_s1 + $0xa0] sm:$0xff]  ;;  %s3111_s17 = smov (!%p425_p12, %s1635_s17), 47  ;;  %s2307_s11 = scalar_lea.vmem %s2306_s15, 4096 }
  0xa9   : > { %v534_v15 = vld [vmem:[%s3059_s1 + $0x110] sm:$0xff]  ;;  %v535_v16 = vld [vmem:[%s3059_s1 + $0x118] sm:$0xff]  ;;  %1670 = vmatpush3.bf16.msra.mxu0 %v548_v8  ;;  %v549_v17 = vpack.c.bf16 %v503_v14, %v502_v12  ;;  %v521_v20 = vld [vmem:[%s3059_s1 + $0xa8] sm:$0xff]  ;;  %s1636_s9 = sshll.u32 %s3111_s17, 3 }
  0xaa   : > { %1813 = vmatprep.subr.bf16.mxu1 %v564_v9  ;;  %v565_v18 = vpack.c.bf16 %v535_v16, %v534_v15  ;;  %v504_v21 = vld [vmem:[%s3059_s1 + $0x20] sm:$0xff]  ;;  %1671 = vmatprep.subr.bf16.mxu0 %v557_v13  ;;  %v558_v22 = vpack.c.bf16 %v521_v20, %v520_v19  ;;  %v505_v23 = vld [vmem:[%s3059_s1 + $0x28] sm:$0xff]  ;;  %v522_v27 = vld [vmem:[%s3059_s1 + $0xb0] sm:$0xff]  ;;  %s2851_s20 = scalar_lea.vmem %s3061_s3, %s1636_s9 }
  0xab   : > { %1814 = vmatpush3.bf16.msra.mxu1 %v564_v9  ;;  %v536_v24 = vld [vmem:[%s3059_s1 + $0x120] sm:$0xff]  ;;  %v537_v25 = vld [vmem:[%s3059_s1 + $0x128] sm:$0xff]  ;;  %v523_v28 = vld [vmem:[%s3059_s1 + $0xb8] sm:$0xff]  ;;  %v550_v31 = vpack.c.bf16 %v505_v23, %v504_v21 }
  0xac   : > { %1815 = vmatprep.subr.bf16.mxu1 %v565_v18  ;;  %v566_v26 = vpack.c.bf16 %v537_v25, %v536_v24  ;;  %v538_v29 = vld [vmem:[%s3059_s1 + $0x130] sm:$0xff]  ;;  %v539_v30 = vld [vmem:[%s3059_s1 + $0x138] sm:$0xff]  ;;  %v559_v32 = vpack.c.bf16 %v523_v28, %v522_v27  ;;  %v524_v36 = vld [vmem:[%s3059_s1 + $0xc0] sm:$0xff] }
  0xad   : > { %1672 = vmatpush3.bf16.msra.mxu0 %v549_v17  ;;  %v506_v33 = vld [vmem:[%s3059_s1 + $0x30] sm:$0xff]  ;;  %v507_v34 = vld [vmem:[%s3059_s1 + $0x38] sm:$0xff]  ;;  %v567_v35 = vpack.c.bf16 %v539_v30, %v538_v29  ;;  %v525_v37 = vld [vmem:[%s3059_s1 + $0xc8] sm:$0xff] }
  0xae   : > { %1673 = vmatprep.subr.bf16.mxu0 %v558_v22  ;;  %v540_v38 = vld [vmem:[%s3059_s1 + $0x140] sm:$0xff]  ;;  %v541_v39 = vld [vmem:[%s3059_s1 + $0x148] sm:$0xff]  ;;  %v551_v40 = vpack.c.bf16 %v507_v34, %v506_v33  ;;  %v560_v41 = vpack.c.bf16 %v525_v37, %v524_v36  ;;  %v526_v45 = vld [vmem:[%s3059_s1 + $0xd0] sm:$0xff] }
  0xaf   : > { %1816 = vmatpush3.bf16.msra.mxu1 %v565_v18  ;;  %v508_v42 = vld [vmem:[%s3059_s1 + $0x40] sm:$0xff]  ;;  %v509_v43 = vld [vmem:[%s3059_s1 + $0x48] sm:$0xff]  ;;  %v568_v44 = vpack.c.bf16 %v541_v39, %v540_v38  ;;  %v527_v46 = vld [vmem:[%s3059_s1 + $0xd8] sm:$0xff] }
  0xb0   : > { %1817 = vmatprep.subr.bf16.mxu1 %v566_v26  ;;  %v510_v47 = vld [vmem:[%s3059_s1 + $0x50] sm:$0xff]  ;;  %v511_v48 = vld [vmem:[%s3059_s1 + $0x58] sm:$0xff]  ;;  %v552_v51 = vpack.c.bf16 %v509_v43, %v508_v42  ;;  %v528_v52 = vld [vmem:[%s3059_s1 + $0xe0] sm:$0xff]  ;;  %v561_v54 = vpack.c.bf16 %v527_v46, %v526_v45 }
  0xb1   : > { %1674 = vmatpush3.bf16.msra.mxu0 %v550_v31  ;;  %v542_v49 = vld [vmem:[%s3059_s1 + $0x150] sm:$0xff]  ;;  %v543_v50 = vld [vmem:[%s3059_s1 + $0x158] sm:$0xff]  ;;  %v529_v53 = vld [vmem:[%s3059_s1 + $0xe8] sm:$0xff]  ;;  %v553_v60 = vpack.c.bf16 %v511_v48, %v510_v47 }
  0xb2   : > { %1675 = vmatprep.subr.bf16.mxu0 %v559_v32  ;;  %v544_v55 = vld [vmem:[%s3059_s1 + $0x160] sm:$0xff]  ;;  %v569_v57 = vpack.c.bf16 %v543_v50, %v542_v49  ;;  %v2156_v58 = vld [vmem:[%s2675_s21 + $0x8] ss:$12 sps:$4 sm:$0xff]   ;;  %v562_v63 = vpack.c.bf16 %v529_v53, %v528_v52  ;;  %v531_v1 = vld [vmem:[%s3059_s1 + $0xf8] sm:$0xff] }
  0xb3   : > { %1818 = vmatpush3.bf16.msra.mxu1 %v566_v26  ;;  %v2155_v56 = vld [vmem:[%s2675_s21 + $0x4] ss:$12 sps:$4 sm:$0xff]   ;;  %v545_v59 = vld [vmem:[%s3059_s1 + $0x168] sm:$0xff]  ;;  %1829 = vmatprep.mubr.bf16.mxu1 %v2156_v58  ;;  %v547_v4 = vld [vmem:[%s3059_s1 + $0x178] sm:$0xff] }
  0xb4   : > { %1819 = vmatprep.subr.bf16.mxu1 %v567_v35  ;;  %732 = vmatprep.mubr.bf16.mxu0 %v2155_v56  ;;  %v512_v61 = vld [vmem:[%s3059_s1 + $0x60] sm:$0xff]  ;;  %v513_v62 = vld [vmem:[%s3059_s1 + $0x68] sm:$0xff]  ;;  %v530_v0 = vld [vmem:[%s3059_s1 + $0xf0] sm:$0xff]  ;;  %v570_v2 = vpack.c.bf16 %v545_v59, %v544_v55 }
  0xb5   : > { %1676 = vmatpush3.bf16.msra.mxu0 %v551_v40  ;;  %v546_v3 = vld [vmem:[%s3059_s1 + $0x170] sm:$0xff]  ;;  %v554_v5 = vpack.c.bf16 %v513_v62, %v512_v61  ;;  %v563_v7 = vpack.c.bf16 %v531_v1, %v530_v0  ;;  %v515_v8 = vld [vmem:[%s3059_s1 + $0x78] sm:$0xff]  ;;  %v2153_v11 = vld [vmem:[%s2675_s21] ss:$12 sps:$4 sm:$0xff]  }
  0xb6   : > { %1677 = vmatprep.subr.bf16.mxu0 %v560_v41  ;;  %v514_v6 = vld [vmem:[%s3059_s1 + $0x70] sm:$0xff]  ;;  %v571_v9 = vpack.c.bf16 %v547_v4, %v546_v3  ;;  %v2157_v12 = vld [vmem:[%s2675_s21 + $0x20] ss:$12 sps:$4 sm:$0xff]   ;;  %v2158_v13 = vld [vmem:[%s2675_s21 + $0x1c] ss:$12 sps:$4 sm:$0xff]  }
  0xb7   : > { %1820 = vmatpush3.bf16.msra.mxu1 %v567_v35  ;;  %v555_v10 = vpack.c.bf16 %v515_v8, %v514_v6  ;;  %v2164_v14 = vld [vmem:[%s2675_s21 + $0x38] ss:$12 sps:$4 sm:$0xff]   ;;  %v947_v16 = vld [vmem:[%s2851_s20 + $0x10] sm:$0xff]  ;;  %v946_v17 = vld [vmem:[%s2851_s20 + $0x8] sm:$0xff] }
  0xb8   : > { %1821 = vmatprep.subr.bf16.mxu1 %v568_v44  ;;  %v945_v15 = vld [vmem:[%s2851_s20] sm:$0xff]  ;;  %973 = vperm.xlu1 %2152, %v947_v16   ;;  %v948_v20 = vld [vmem:[%s2851_s20 + $0x18] sm:$0xff]  ;;  %v2172_v22 = vld [vmem:[%s2675_s21 + $0x68] ss:$12 sps:$4 sm:$0xff]  }
  0xb9   : > { %1678 = vmatpush3.bf16.msra.mxu0 %v552_v51  ;;  %963 = vperm.xlu0 %2151, %v945_v15   ;;  %v2160_v18 = vld [vmem:[%s2675_s21 + $0x18] ss:$12 sps:$4 sm:$0xff]   ;;  %v2161_v19 = vld [vmem:[%s2675_s21 + $0x34] ss:$12 sps:$4 sm:$0xff]   ;;  %v2165_v21 = vld [vmem:[%s2675_s21 + $0x50] ss:$12 sps:$4 sm:$0xff]  }
  0xba   : > { %1679 = vmatprep.subr.bf16.mxu0 %v561_v54  ;;  %v949_v23 = vld [vmem:[%s2851_s20 + $0x20] sm:$0xff]  ;;  %v1090_v25 = vld [vmem:[#allocation9 + $0x8] sm:$0xff]  ;;  %v1091_v28 = vld [vmem:[#allocation9 + $0x10] sm:$0xff] }
  0xbb   : > { %1822 = vmatpush3.bf16.msra.mxu1 %v568_v44  ;;  %v1089_v24 = vld [vmem:[#allocation9] sm:$0xff]  ;;  %v1074_v27 = vld [vmem:[#allocation8 + $0x8] sm:$0xff]  ;;  %v1092_v29 = vld [vmem:[#allocation9 + $0x18] sm:$0xff] }
  0xbc   : > { %1823 = vmatprep.subr.bf16.mxu1 %v569_v57  ;;  %v1073_v26 = vld [vmem:[#allocation8] sm:$0xff]  ;;  %978 = vperm.xlu1 %2152, %v948_v20   ;;  %v950_v30 = vld [vmem:[%s2851_s20 + $0x28] sm:$0xff]  ;;  %v1957_v31 = vpack.c.bf16 %v1090_v25, %v1089_v24  ;;  %v1075_v33 = vld [vmem:[#allocation8 + $0x10] sm:$0xff]  ;;  %v1961_v36 = vpack.c.bf16 %v1092_v29, %v1091_v28 }
  0xbd   : > { %1680 = vmatpush3.bf16.msra.mxu0 %v553_v60  ;;  %968 = vperm.xlu0 %2151, %v946_v17   ;;  %v2865_v32 = vpack.c.bf16 %v1074_v27, %v1073_v26  ;;  %v1076_v34 = vld [vmem:[#allocation8 + $0x18] sm:$0xff]  ;;  %v951_v35 = vld [vmem:[%s2851_s20 + $0x30] sm:$0xff]  ;;  %v2173_v41 = vld [vmem:[%s2675_s21 + $0x80] ss:$12 sps:$4 sm:$0xff]  }
  0xbe   : > { %1681 = vmatprep.subr.bf16.mxu0 %v562_v63  ;;  %v2868_v37 = vpack.c.bf16 %v1076_v34, %v1075_v33  ;;  %v952_v38 = vld [vmem:[%s2851_s20 + $0x38] sm:$0xff]  ;;  %v953_v42 = vld [vmem:[%s2851_s20 + $0x40] sm:$0xff]  ;;  %v1094_v44 = vld [vmem:[#allocation9 + $0x28] sm:$0xff] }
  0xbf   : > { %1824 = vmatpush3.bf16.msra.mxu1 %v569_v57  ;;  %v2163_v39 = vld [vmem:[%s2675_s21 + $0x30] ss:$12 sps:$4 sm:$0xff]   ;;  %v2166_v40 = vld [vmem:[%s2675_s21 + $0x4c] ss:$12 sps:$4 sm:$0xff]   ;;  %v1093_v43 = vld [vmem:[#allocation9 + $0x20] sm:$0xff] }
  0xc0   : > { %1825 = vmatprep.subr.bf16.mxu1 %v570_v2  ;;  %988 = vperm.xlu1 %2152, %v950_v30   ;;  %v2180_v45 = vld [vmem:[%s2675_s21 + $0x98] ss:$12 sps:$4 sm:$0xff]   ;;  %v1078_v47 = vld [vmem:[#allocation8 + $0x28] sm:$0xff]  ;;  %v1965_v49 = vpack.c.bf16 %v1094_v44, %v1093_v43  ;;  %v955_v50 = vld [vmem:[%s2851_s20 + $0x50] sm:$0xff] }
  0xc1   : > { %1682 = vmatpush3.bf16.msra.mxu0 %v554_v5  ;;  %983 = vperm.xlu0 %2151, %v949_v23   ;;  %v1077_v46 = vld [vmem:[#allocation8 + $0x20] sm:$0xff]  ;;  %v954_v48 = vld [vmem:[%s2851_s20 + $0x48] sm:$0xff]  ;;  %v956_v53 = vld [vmem:[%s2851_s20 + $0x58] sm:$0xff] }
  0xc2   : > { %1683 = vmatprep.subr.bf16.mxu0 %v563_v7  ;;  %v2881_v51 = vpack.c.bf16 %v1078_v47, %v1077_v46  ;;  %v2168_v52 = vld [vmem:[%s2675_s21 + $0x48] ss:$12 sps:$4 sm:$0xff]   ;;  %v1096_v55 = vld [vmem:[#allocation9 + $0x38] sm:$0xff]  ;;  %v2169_v56 = vld [vmem:[%s2675_s21 + $0x64] ss:$12 sps:$4 sm:$0xff]  }
  0xc3   : > { %1826 = vmatpush3.bf16.msra.mxu1 %v570_v2  ;;  %v1095_v54 = vld [vmem:[#allocation9 + $0x30] sm:$0xff]  ;;  %v1080_v58 = vld [vmem:[#allocation8 + $0x38] sm:$0xff]  ;;  %v957_v60 = vld [vmem:[%s2851_s20 + $0x60] sm:$0xff] }
  0xc4   : > { %1827 = vmatprep.subr.bf16.mxu1 %v571_v9  ;;  %998 = vperm.xlu1 %2152, %v952_v38   ;;  %v1079_v57 = vld [vmem:[#allocation8 + $0x30] sm:$0xff]  ;;  %v1097_v61 = vld [vmem:[#allocation9 + $0x40] sm:$0xff]  ;;  %v1969_v62 = vpack.c.bf16 %v1096_v55, %v1095_v54  ;;  %v1098_v63 = vld [vmem:[#allocation9 + $0x48] sm:$0xff] }
  0xc5   : > { %1684 = vmatpush3.bf16.msra.mxu0 %v555_v10  ;;  %993 = vperm.xlu0 %2151, %v951_v35   ;;  %v2181_v59 = vld [vmem:[%s2675_s21 + $0xb0] ss:$12 sps:$4 sm:$0xff]   ;;  %v1081_v0 = vld [vmem:[#allocation8 + $0x40] sm:$0xff]  ;;  %v1082_v1 = vld [vmem:[#allocation8 + $0x48] sm:$0xff]  ;;  %v2892_v3 = vpack.c.bf16 %v1080_v58, %v1079_v57  ;;  %v1973_v5 = vpack.c.bf16 %v1098_v63, %v1097_v61 }
  0xc6   : > { %1990 = vmatprep.subr.bf16.mxu0 %v2865_v32  ;;  %v958_v2 = vld [vmem:[%s2851_s20 + $0x68] sm:$0xff]  ;;  %v959_v4 = vld [vmem:[%s2851_s20 + $0x70] sm:$0xff]  ;;  %v2895_v6 = vpack.c.bf16 %v1082_v1, %v1081_v0  ;;  %v1100_v8 = vld [vmem:[#allocation9 + $0x58] sm:$0xff] }
  0xc7   : > { %1828 = vmatpush3.bf16.msra.mxu1 %v571_v9  ;;  %v1099_v7 = vld [vmem:[#allocation9 + $0x50] sm:$0xff]  ;;  %v960_v9 = vld [vmem:[%s2851_s20 + $0x78] sm:$0xff]  ;;  %v1085_v23 = vld [vmem:[#allocation8 + $0x60] sm:$0xff] }
  0xc8   : > { %733 = vmatmul.mubr.bf16.vlgmr.msra.gmra.mrb[0].mxu0 %v2153_v11  ;;  %1958 = vmatprep.subr.bf16.mxu1 %v1957_v31  ;;  %v1083_v10 = vld [vmem:[#allocation8 + $0x50] sm:$0xff]  ;;  %v1084_v11 = vld [vmem:[#allocation8 + $0x58] sm:$0xff]  ;;  %v1086_v25 = vld [vmem:[#allocation8 + $0x68] sm:$0xff] }
  0xc9   : > { %740 = vmatprep.mubr.bf16.mxu0 %v2158_v13  ;;  %1992 = vmatpush3.bf16.msra.mxu0 %v2865_v32  ;;  %v1977_v13 = vpack.c.bf16 %v1100_v8, %v1099_v7  ;;  %v2903_v15 = vpack.c.bf16 %v1084_v11, %v1083_v10  ;;  %v2176_v16 = vld [vmem:[%s2675_s21 + $0x78] ss:$12 sps:$4 sm:$0xff]   ;;  %v2177_v17 = vld [vmem:[%s2675_s21 + $0x94] ss:$12 sps:$4 sm:$0xff]   ;;  %v2913_v26 = vpack.c.bf16 %v1086_v25, %v1085_v23  ;;  %v1058_v35 = vld [vmem:[%s2685_s23 + $0x8] sm:$0xff] }
  0xca   : > { %1830 = vmatmul.mubr.bf16.vlgmr.msra.gmra.mrb[0].mxu1 %v2157_v12  ;;  %1994 = vmatprep.subr.bf16.mxu0 %v2868_v37  ;;  %v2171_v12 = vld [vmem:[%s2675_s21 + $0x60] ss:$12 sps:$4 sm:$0xff]   ;;  %v2184_v20 = vld [vmem:[%s2675_s21 + $0xa8] ss:$12 sps:$4 sm:$0xff]   ;;  %v1104_v28 = vld [vmem:[#allocation9 + $0x78] sm:$0xff] }
  0xcb   : > { %1833 = vmatprep.mubr.bf16.mxu1 %v2164_v14  ;;  %1960 = vmatpush3.bf16.msra.mxu1 %v1957_v31  ;;  %v2174_v14 = vld [vmem:[%s2675_s21 + $0x7c] ss:$12 sps:$4 sm:$0xff]   ;;  %v1103_v27 = vld [vmem:[#allocation9 + $0x70] sm:$0xff]  ;;  %v1057_v34 = vld [vmem:[%s2685_s23] sm:$0xff] }
  0xcc   : > { %1962 = vmatprep.subr.bf16.mxu1 %v1961_v36  ;;  %1003 = vperm.xlu0 %2151, %v953_v42   ;;  %v1087_v29 = vld [vmem:[#allocation8 + $0x70] sm:$0xff]  ;;  %v1985_v30 = vpack.c.bf16 %v1104_v28, %v1103_v27  ;;  %v1088_v31 = vld [vmem:[#allocation8 + $0x78] sm:$0xff] }
  0xcd   : > { %1008 = vperm.xlu1 %2152, %v954_v48   ;;  %1996 = vmatpush3.bf16.msra.mxu0 %v2868_v37  ;;  %v2917_v33 = vpack.c.bf16 %v1088_v31, %v1087_v29  ;;  %v1060_v38 = vld [vmem:[%s2685_s23 + $0x18] sm:$0xff] }
  0xce   : > { %1998 = vmatprep.subr.bf16.mxu0 %v2881_v51  ;;  %v1064_v42 = vld [vmem:[%s2685_s23 + $0x38] sm:$0xff] }
  0xcf   : > { %1964 = vmatpush3.bf16.msra.mxu1 %v1961_v36  ;;  %v1059_v36 = vld [vmem:[%s2685_s23 + $0x10] sm:$0xff] }
  0xd0   : > { %741 = vmatmul.mubr.bf16.gmra.mrb[4].mxu0 %v2160_v18  ;;  %1013 = vperm.xlu0 %2151, %v955_v50   ;;  %v2179_v18 = vld [vmem:[%s2675_s21 + $0x90] ss:$12 sps:$4 sm:$0xff]  }
  0xd1   : > { %748 = vmatprep.mubr.bf16.mxu0 %v2161_v19  ;;  %1966 = vmatprep.subr.bf16.mxu1 %v1965_v49  ;;  %v2182_v19 = vld [vmem:[%s2675_s21 + $0xac] ss:$12 sps:$4 sm:$0xff]  }
  0xd2   : > { %1834 = vmatmul.mubr.bf16.gmra.mrb[4].mxu1 %v2165_v21  ;;  %1018 = vperm.xlu1 %2152, %v956_v53   ;;  %v1101_v21 = vld [vmem:[#allocation9 + $0x60] sm:$0xff] }
  0xd3   : > { %1837 = vmatprep.mubr.bf16.mxu1 %v2172_v22  ;;  %1968 = vmatpush3.bf16.msra.mxu1 %v1965_v49  ;;  %v1102_v22 = vld [vmem:[#allocation9 + $0x68] sm:$0xff] }
  0xd4   : > { %2000 = vmatpush3.bf16.msra.mxu0 %v2881_v51  ;;  %1023 = vperm.xlu0 %2151, %v957_v60   ;;  %v1981_v24 = vpack.c.bf16 %v1102_v22, %v1101_v21 }
  0xd5   : > { %1970 = vmatprep.subr.bf16.mxu1 %v1969_v62  ;;  %2002 = vmatprep.subr.bf16.mxu0 %v2892_v3 }
  0xd6   : > { %1028 = vperm.xlu1 %2152, %v958_v2  }
  0xd7   : > { %1972 = vmatpush3.bf16.msra.mxu1 %v1969_v62 }
  0xd8   : > { %749 = vmatmul.mubr.bf16.gmra.mrb[8].mxu0 %v2163_v39  ;;  %1033 = vperm.xlu0 %2151, %v959_v4   ;;  %v1061_v39 = vld [vmem:[%s2685_s23 + $0x20] sm:$0xff] }
  0xd9   : > { %756 = vmatprep.mubr.bf16.mxu0 %v2166_v40  ;;  %2004 = vmatpush3.bf16.msra.mxu0 %v2892_v3  ;;  %v1062_v40 = vld [vmem:[%s2685_s23 + $0x28] sm:$0xff] }
  0xda   : > { %1838 = vmatmul.mubr.bf16.gmra.mrb[8].mxu1 %v2173_v41  ;;  %1974 = vmatprep.subr.bf16.mxu1 %v1973_v5  ;;  %v1063_v41 = vld [vmem:[%s2685_s23 + $0x30] sm:$0xff] }
  0xdb   : > { %1841 = vmatprep.mubr.bf16.mxu1 %v2180_v45  ;;  %2006 = vmatprep.subr.bf16.mxu0 %v2895_v6 }
  0xdc   : > { %1038 = vperm.xlu1 %2152, %v960_v9   ;;  %1976 = vmatpush3.bf16.msra.mxu1 %v1973_v5 }
  0xdd   : > { %1978 = vmatprep.subr.bf16.mxu1 %v1977_v13  ;;  %2008 = vmatpush3.bf16.msra.mxu0 %v2895_v6 }
  0xde   : > { %2010 = vmatprep.subr.bf16.mxu0 %v2903_v15 }
  0xe0   : > { %757 = vmatmul.mubr.bf16.gmra.mrb[12].mxu0 %v2168_v52  ;;  %1980 = vmatpush3.bf16.msra.mxu1 %v1977_v13 }
  0xe1   : > { %764 = vmatprep.mubr.bf16.mxu0 %v2169_v56  ;;  %2012 = vmatpush3.bf16.msra.mxu0 %v2903_v15 }
  0xe2   : > { %1842 = vmatmul.mubr.bf16.gmra.mrb[12].mxu1 %v2181_v59  ;;  %1982 = vmatprep.subr.bf16.mxu1 %v1981_v24 }
  0xe3   : > { %2014 = vmatprep.subr.bf16.mxu0 %v2913_v26 }
  0xe4   : > { %1984 = vmatpush3.bf16.msra.mxu1 %v1981_v24 }
  0xe5   : > { %2016 = vmatpush3.bf16.msra.mxu0 %v2913_v26  ;;  %1986 = vmatprep.subr.bf16.mxu1 %v1985_v30 }
  0xe6   : > { %2018 = vmatprep.subr.bf16.mxu0 %v2917_v33 }
  0xe8   : > { %765 = vmatmul.mubr.bf16.gmra.mrb[16].mxu0 %v2171_v12  ;;  %1988 = vmatpush3.bf16.msra.mxu1 %v1985_v30 }
  0xe9   : > { %772 = vmatprep.mubr.bf16.mxu0 %v2174_v14  ;;  %2020 = vmatpush3.bf16.msra.mxu0 %v2917_v33 }
  0xea   : > { %2021 = vmatprep.subr.bf16.mxu1 %v2865_v32 }
  0xf0   : > { %773 = vmatmul.mubr.bf16.gmra.mrb[20].mxu0 %v2176_v16 }
  0xf1   : > { %780 = vmatprep.mubr.bf16.mxu0 %v2177_v17 }
  0xf8   : > { %781 = vmatmul.mubr.bf16.gmra.mrb[24].mxu0 %v2179_v18 }
  0xf9   : > { %788 = vmatprep.mubr.bf16.mxu0 %v2182_v19 }
 0x100   : > { %789 = vmatmul.mubr.bf16.gmra.mrb[28].mxu0 %v2184_v20 }
 0x101   : > { %1933 = vmatprep.mubr.f32.mxu0 %v1057_v34 }
 0x108   : > { %1934 = vmatmul.mubr.f32.vlgmr.msra.gmra.mrb[32].mxu0 %v1058_v35 }
 0x109   : > { %1936 = vmatprep.mubr.f32.mxu0 %v1059_v36 }
 0x10c   : > { %1937 = vmatmul.mubr.f32.gmra.mrb[34].mxu0 %v1060_v38 }
 0x10d   : > { %1939 = vmatprep.mubr.f32.mxu0 %v1061_v39 }
 0x110   : > { %1940 = vmatmul.mubr.f32.gmra.mrb[36].mxu0 %v1062_v40 }
 0x111   : > { %1942 = vmatprep.mubr.f32.mxu0 %v1063_v41 }
 0x114   : > { %1943 = vmatmul.mubr.f32.gmra.mrb[38].mxu0 %v1064_v42 }
 0x137   : > { %v974_v59 = vpop.permute.xlu1 %973 }
 0x138   : > { %v964_v43 = vpop.permute.xlu0 %963 }
 0x13b   : > { %v979_v12 = vpop.permute.xlu1 %978 }
 0x13c   : > { %v969_v56 = vpop.permute.xlu0 %968 }
 0x13f   : > { %v989_v28 = vpop.permute.xlu1 %988 }
 0x19b   : > { %v1685_v44 = vpop.f32.mrb[0].mxu0 }
 0x19c   : > { %v1686_v45 = vpop.f32.mrb[1].mxu0 }
 0x19d   : > { %v1831_v46 = vpop.f32.mrb[0].mxu1  ;;  %v1687_v47 = vadd.f32 %v1686_v45, %v1685_v44  ;;  %v1688_v48 = vpop.f32.mrb[2].mxu0 }
 0x19e   : > { %v831_v49 = vpop.f32.mrb[1].mxu1  ;;  %v1689_v50 = vpop.f32.mrb[3].mxu0 }
 0x19f   : > { %v1832_v52 = vpop.f32.mrb[2].mxu1  ;;  %v1690_v53 = vadd.f32 %v1689_v50, %v1688_v48  ;;  %v832_v54 = vadd.f32 %v1687_v47, %v831_v49  ;;  %v999_v45 = vpop.permute.xlu1 %998 }
 0x1a0   : > { %v834_v55 = vpop.f32.mrb[3].mxu1 }
 0x1a1   : > { %v1041_v57 = vmul.f32 %v964_v43, %v832_v54  ;;  %v835_v58 = vadd.f32 %v1690_v53, %v834_v55 }
 0x1a3   : > { %v1042_v60 = vmul.f32 %v969_v56, %v835_v58  ;;  %v1691_v61 = vpop.f32.mrb[4].mxu0  ;;  %1877 = vmatprep.mubr.f32.mxu1 %v1041_v57 }
 0x1a4   : > { %v1692_v62 = vpop.f32.mrb[5].mxu0 }
 0x1a5   : > { %v1835_v63 = vpop.f32.mrb[4].mxu1  ;;  %v1693_v0 = vadd.f32 %v1692_v62, %v1691_v61  ;;  %v1694_v1 = vpop.f32.mrb[6].mxu0  ;;  %1878 = vmatmul.mubr.f32.vlgmr.msra.gmra.mrb[16].mxu1 %v1042_v60 }
 0x1a6   : > { %v847_v2 = vpop.f32.mrb[5].mxu1  ;;  %v1695_v4 = vpop.f32.mrb[7].mxu0  ;;  %2029 = vmatpush3.bf16.msra.mxu1 %v2865_v32 }
 0x1a7   : > { %v1836_v5 = vpop.f32.mrb[6].mxu1  ;;  %v840_v7 = vadd.f32 %v1831_v46, %v1693_v0  ;;  %v1696_v8 = vadd.f32 %v1695_v4, %v1694_v1  ;;  %2022 = vmatprep.subr.bf16.mxu1 %v2868_v37 }
 0x1a8   : > { %v850_v9 = vpop.f32.mrb[7].mxu1 }
 0x1a9   : > { %v843_v10 = vadd.f32 %v1832_v52, %v1696_v8  ;;  %v1043_v11 = vmul.f32 %v974_v59, %v840_v7 }
 0x1aa   : > { %2030 = vmatpush3.bf16.msra.mxu1 %v2868_v37  ;;  %v984_v37 = vpop.permute.xlu0 %983 }
 0x1ab   : > { %v1697_v13 = vpop.f32.mrb[8].mxu0  ;;  %1880 = vmatprep.mubr.f32.mxu1 %v1043_v11  ;;  %v1044_v14 = vmul.f32 %v979_v12, %v843_v10  ;;  %2023 = vmatprep.subr.bf16.mxu1 %v2881_v51 }
 0x1ac   : > { %v1698_v16 = vpop.f32.mrb[9].mxu0 }
 0x1ad   : > { %v2934_v17 = vpop.f32.mrb[8].mxu1  ;;  %v1699_v18 = vadd.f32 %v1698_v16, %v1697_v13  ;;  %v1700_v32 = vpop.f32.mrb[10].mxu0  ;;  %1881 = vmatmul.mubr.f32.gmra.mrb[18].mxu1 %v1044_v14 }
 0x1ae   : > { %v863_v19 = vpop.f32.mrb[9].mxu1  ;;  %v1701_v20 = vpop.f32.mrb[11].mxu0  ;;  %2031 = vmatpush3.bf16.msra.mxu1 %v2881_v51 }
 0x1af   : > { %v1840_v21 = vpop.f32.mrb[10].mxu1  ;;  %v1702_v22 = vadd.f32 %v1701_v20, %v1700_v32  ;;  %v848_v23 = vadd.f32 %v1699_v18, %v847_v2  ;;  %2024 = vmatprep.subr.bf16.mxu1 %v2892_v3  ;;  %v994_v42 = vpop.permute.xlu0 %993 }
 0x1b0   : > { %v866_v24 = vpop.f32.mrb[11].mxu1 }
 0x1b1   : > { %v1045_v25 = vmul.f32 %v984_v37, %v848_v23  ;;  %v851_v27 = vadd.f32 %v1702_v22, %v850_v9 }
 0x1b2   : > { %2032 = vmatpush3.bf16.msra.mxu1 %v2892_v3 }
 0x1b3   : > { %v1046_v29 = vmul.f32 %v989_v28, %v851_v27  ;;  %v1703_v30 = vpop.f32.mrb[12].mxu0  ;;  %1883 = vmatprep.mubr.f32.mxu1 %v1045_v25  ;;  %2025 = vmatprep.subr.bf16.mxu1 %v2895_v6  ;;  %v1004_v54 = vpop.permute.xlu0 %1003 }
 0x1b4   : > { %v1704_v31 = vpop.f32.mrb[13].mxu0 }
 0x1b5   : > { %v2940_v34 = vpop.f32.mrb[12].mxu1  ;;  %v1705_v51 = vadd.f32 %v1704_v31, %v1703_v30  ;;  %v1706_v35 = vpop.f32.mrb[14].mxu0  ;;  %1884 = vmatmul.mubr.f32.gmra.mrb[20].mxu1 %v1046_v29  ;;  %v1065_v30 = vld [vmem:[%s2685_s23 + $0x40] sm:$0xff]  ;;  %v1066_v31 = vld [vmem:[%s2685_s23 + $0x48] sm:$0xff] }
 0x1b6   : > { %v879_v36 = vpop.f32.mrb[13].mxu1  ;;  %v1707_v38 = vpop.f32.mrb[15].mxu0  ;;  %2033 = vmatpush3.bf16.msra.mxu1 %v2895_v6 }
 0x1b7   : > { %v2942_v39 = vpop.f32.mrb[14].mxu1  ;;  %v856_v40 = vadd.f32 %v1835_v63, %v1705_v51  ;;  %v1708_v41 = vadd.f32 %v1707_v38, %v1706_v35  ;;  %2026 = vmatprep.subr.bf16.mxu1 %v2903_v15  ;;  %v1014_v0 = vpop.permute.xlu0 %1013  ;;  %v1067_v51 = vld [vmem:[%s2685_s23 + $0x50] sm:$0xff]  ;;  %v1069_v35 = vld [vmem:[%s2685_s23 + $0x60] sm:$0xff] }
 0x1b8   : > { %v882_v3 = vpop.f32.mrb[15].mxu1  ;;  %v1071_v38 = vld [vmem:[%s2685_s23 + $0x70] sm:$0xff] }
 0x1b9   : > { %v859_v43 = vadd.f32 %v1836_v5, %v1708_v41  ;;  %v1047_v44 = vmul.f32 %v994_v42, %v856_v40 }
 0x1ba   : > { %2034 = vmatpush3.bf16.msra.mxu1 %v2903_v15  ;;  %v1009_v15 = vpop.permute.xlu1 %1008 }
 0x1bb   : > { %v1709_v46 = vpop.f32.mrb[16].mxu0  ;;  %1886 = vmatprep.mubr.f32.mxu1 %v1047_v44  ;;  %v1048_v47 = vmul.f32 %v999_v45, %v859_v43  ;;  %2027 = vmatprep.subr.bf16.mxu1 %v2913_v26  ;;  %v1024_v13 = vpop.permute.xlu0 %1023 }
 0x1bc   : > { %v1710_v48 = vpop.f32.mrb[17].mxu0 }
 0x1bd   : > { %v1711_v49 = vadd.f32 %v1710_v48, %v1709_v46  ;;  %v1712_v50 = vpop.f32.mrb[18].mxu0  ;;  %1887 = vmatmul.mubr.f32.gmra.mrb[22].mxu1 %v1048_v47  ;;  %v2965_v48 = vld [vmem:[%s3064_s6] ss:$0 sm:$0xff] }
 0x1be   : > { %v1713_v6 = vpop.f32.mrb[19].mxu0  ;;  %2035 = vmatpush3.bf16.msra.mxu1 %v2913_v26  ;;  %v1019_v4 = vpop.permute.xlu1 %1018 }
 0x1bf   : > { %v1714_v52 = vadd.f32 %v1713_v6, %v1712_v50  ;;  %v864_v53 = vadd.f32 %v1711_v49, %v863_v19  ;;  %2028 = vmatprep.subr.bf16.mxu1 %v2917_v33  ;;  %v1034_v37 = vpop.permute.xlu0 %1033 }
 0x1c1   : > { %v1049_v55 = vmul.f32 %v1004_v54, %v864_v53  ;;  %v867_v56 = vadd.f32 %v1714_v52, %v866_v24 }
 0x1c2   : > { %2036 = vmatpush3.bf16.msra.mxu1 %v2917_v33  ;;  %v1029_v18 = vpop.permute.xlu1 %1028 }
 0x1c3   : > { %v1050_v57 = vmul.f32 %v1009_v15, %v867_v56  ;;  %v1715_v58 = vpop.f32.mrb[20].mxu0  ;;  %1889 = vmatprep.mubr.f32.mxu1 %v1049_v55 }
 0x1c4   : > { %v1716_v59 = vpop.f32.mrb[21].mxu0 }
 0x1c5   : > { %v1717_v60 = vadd.f32 %v1716_v59, %v1715_v58  ;;  %v1718_v61 = vpop.f32.mrb[22].mxu0  ;;  %1890 = vmatmul.mubr.f32.gmra.mrb[24].mxu1 %v1050_v57 }
 0x1c6   : > { %v1719_v62 = vpop.f32.mrb[23].mxu0  ;;  %v1039_v28 = vpop.permute.xlu1 %1038 }
 0x1c7   : > { %v872_v26 = vadd.f32 %v2934_v17, %v1717_v60  ;;  %v1720_v63 = vadd.f32 %v1719_v62, %v1718_v61 }
 0x1c9   : > { %v875_v1 = vadd.f32 %v1840_v21, %v1720_v63  ;;  %v1051_v2 = vmul.f32 %v1014_v0, %v872_v26 }
 0x1cb   : > { %v1721_v5 = vpop.f32.mrb[24].mxu0  ;;  %1892 = vmatprep.mubr.f32.mxu1 %v1051_v2  ;;  %v1052_v7 = vmul.f32 %v1019_v4, %v875_v1 }
 0x1cc   : > { %v1722_v8 = vpop.f32.mrb[25].mxu0 }
 0x1cd   : > { %v1723_v33 = vadd.f32 %v1722_v8, %v1721_v5  ;;  %v1724_v9 = vpop.f32.mrb[26].mxu0  ;;  %1893 = vmatmul.mubr.f32.gmra.mrb[26].mxu1 %v1052_v7 }
 0x1ce   : > { %v1725_v10 = vpop.f32.mrb[27].mxu0 }
 0x1cf   : > { %v1726_v11 = vadd.f32 %v1725_v10, %v1724_v9  ;;  %v880_v12 = vadd.f32 %v1723_v33, %v879_v36  ;;  %v1070_v36 = vld [vmem:[%s2685_s23 + $0x68] sm:$0xff] }
 0x1d1   : > { %v1053_v14 = vmul.f32 %v1024_v13, %v880_v12  ;;  %v883_v16 = vadd.f32 %v1726_v11, %v882_v3 }
 0x1d3   : > { %v1054_v17 = vmul.f32 %v1029_v18, %v883_v16  ;;  %v1727_v32 = vpop.f32.mrb[28].mxu0  ;;  %1895 = vmatprep.mubr.f32.mxu1 %v1053_v14 }
 0x1d4   : > { %v1728_v19 = vpop.f32.mrb[29].mxu0 }
 0x1d5   : > { %v1729_v20 = vadd.f32 %v1728_v19, %v1727_v32  ;;  %v1730_v21 = vpop.f32.mrb[30].mxu0  ;;  %1896 = vmatmul.mubr.f32.gmra.mrb[28].mxu1 %v1054_v17 }
 0x1d6   : > { %v1731_v22 = vpop.f32.mrb[31].mxu0 }
 0x1d7   : > { %v888_v23 = vadd.f32 %v2940_v34, %v1729_v20  ;;  %v1732_v24 = vadd.f32 %v1731_v22, %v1730_v21  ;;  %v1068_v34 = vld [vmem:[%s2685_s23 + $0x58] sm:$0xff] }
 0x1d9   : > { %v891_v25 = vadd.f32 %v2942_v39, %v1732_v24  ;;  %v1055_v27 = vmul.f32 %v1034_v37, %v888_v23  ;;  %v1072_v39 = vld [vmem:[%s2685_s23 + $0x78] sm:$0xff]  ;;  %s2971_s23 = scalar_lea.vmem [#allocation11], %s1631_s14  ;;  %s1668_s14 = sshll.u32 %s2387_s27, 11 }
 0x1da   : > { %s1464_s4 = sshll.u32 %s2971_s23, 4  ;;  %s3006_s13 = scalar_lea.hbm %s3065_s7, %s1668_s14  ;;  %s3008_s4 = int_to_ptr.vmem [resolvable:$true] %s1464_s4 }
 0x1db   : > { %1898 = vmatprep.mubr.f32.mxu1 %v1055_v27  ;;  %v1056_v29 = vmul.f32 %v1039_v28, %v891_v25  ;;  %v1935_v40 = vpop.f32.mrb[32].mxu0  ;;  %s1451_s27 = scalar_lea.sflag [#allocation5], %s2671_s16  ;;  %s2301_s26 = scalar_lea.vmem %s3008_s4, 2048 }
 0x1dc   : > { %v1316_v41 = vpop.f32.mrb[33].mxu0  ;;  %p2302_p1 = scmp.ne.s32.totalorder %s3008_s4, %s2301_s26  ;;  %p2308_p6 = scmp.lt.s32.totalorder %s3008_s4, %s2306_s15 }
 0x1dd   : > { %1899 = vmatmul.mubr.f32.gmra.mrb[30].mxu1 %v1056_v29  ;;  %p2309_p8 = scmp.lt.s32.totalorder %s2307_s11, %s2301_s26 }
 0x1de   : > { %1945 = vmatprep.mubr.f32.mxu1 %v1065_v30  ;;  %p2303_p7 = pnand %p2302_p1, %p2576_p11 }
 0x1df   : > { %v1938_v3 = vpop.f32.mrb[34].mxu0  ;;  %p2310_p10 = por %p2309_p8, %p2308_p6 }
 0x1e0   : > { %v1326_v42 = vpop.f32.mrb[35].mxu0  ;;  %p2304_p2 = pneg %p2303_p7 }
 0x1e1   : > { %1946 = vmatmul.mubr.f32.vlgmr.msra.gmra.mrb[24].mxu1 %v1066_v31 }
 0x1e2   : > { %1948 = vmatprep.mubr.f32.mxu1 %v1067_v51  ;;  %p2311_p3 = pnand %p2310_p10, %p2304_p2 }
 0x1e3   : > { %v1941_v43 = vpop.f32.mrb[36].mxu0 }
 0x1e4   : > { %v1336_v44 = vpop.f32.mrb[37].mxu0 }
 0x1e5   : > { %1949 = vmatmul.mubr.f32.gmra.mrb[26].mxu1 %v1068_v34 }
 0x1e6   : > { %1951 = vmatprep.mubr.f32.mxu1 %v1069_v35 }
 0x1e7   : > { %v1944_v45 = vpop.f32.mrb[38].mxu0 }
 0x1e8   : > { %v1346_v46 = vpop.f32.mrb[39].mxu0 }
 0x1e9   : > { %1952 = vmatmul.mubr.f32.gmra.mrb[28].mxu1 %v1070_v36 }
 0x1ea   : > { %1954 = vmatprep.mubr.f32.mxu1 %v1071_v38 }
 0x1ed   : > { %1955 = vmatmul.mubr.f32.gmra.mrb[30].mxu1 %v1072_v39 }
 0x278   : > { %v1879_v47 = vpop.f32.mrb[16].mxu1 }
 0x279   : > { %v1322_v49 = vadd.f32 %v1935_v40, %v1879_v47  ;;  %v1171_v50 = vpop.f32.mrb[17].mxu1 }
 0x27a   : > { %v1317_v6 = vadd.f32 %v1316_v41, %v1171_v50 }
 0x27b   : > { %v1403_v52 = vadd.f32 %v2965_v48, %v1322_v49 }
 0x27c   : > { %v1402_v53 = vadd.f32 %v2965_v48, %v1317_v6 }
 0x27d   : > { %v1419_v54 = vmax.f32 %v1403_v52, 0.0 }
 0x27e   : > { %v1418_v55 = vmax.f32 %v1402_v53, 0.0 }
 0x27f   : > { %1435 = vst [vmem:[%s2971_s23 + $0x8] sm:$0xff] %v1419_v54 }
 0x280   : > { %1434 = vst [vmem:[%s2971_s23] sm:$0xff] %v1418_v55  ;;  %v1882_v56 = vpop.f32.mrb[18].mxu1 }
 0x281   : > { %v1332_v15 = vadd.f32 %v1938_v3, %v1882_v56  ;;  %v1181_v57 = vpop.f32.mrb[19].mxu1 }
 0x282   : > { %v1327_v58 = vadd.f32 %v1326_v42, %v1181_v57 }
 0x283   : > { %v1405_v59 = vadd.f32 %v2965_v48, %v1332_v15 }
 0x284   : > { %v1404_v60 = vadd.f32 %v2965_v48, %v1327_v58 }
 0x285   : > { %v1421_v61 = vmax.f32 %v1405_v59, 0.0 }
 0x286   : > { %v1420_v62 = vmax.f32 %v1404_v60, 0.0 }
 0x287   : > { %1437 = vst [vmem:[%s2971_s23 + $0x18] sm:$0xff] %v1421_v61 }
 0x288   : > { %1436 = vst [vmem:[%s2971_s23 + $0x10] sm:$0xff] %v1420_v62  ;;  %v1885_v26 = vpop.f32.mrb[20].mxu1 }
 0x289   : > { %v1342_v63 = vadd.f32 %v1941_v43, %v1885_v26  ;;  %v1191_v0 = vpop.f32.mrb[21].mxu1 }
 0x28a   : > { %v1337_v1 = vadd.f32 %v1336_v44, %v1191_v0 }
 0x28b   : > { %v1407_v2 = vadd.f32 %v2965_v48, %v1342_v63 }
 0x28c   : > { %v1406_v4 = vadd.f32 %v2965_v48, %v1337_v1 }
 0x28d   : > { %v1423_v5 = vmax.f32 %v1407_v2, 0.0 }
 0x28e   : > { %v1422_v7 = vmax.f32 %v1406_v4, 0.0 }
 0x28f   : > { %1439 = vst [vmem:[%s2971_s23 + $0x28] sm:$0xff] %v1423_v5 }
 0x290   : > { %1438 = vst [vmem:[%s2971_s23 + $0x20] sm:$0xff] %v1422_v7  ;;  %v1888_v8 = vpop.f32.mrb[22].mxu1 }
 0x291   : > { %v1352_v33 = vadd.f32 %v1944_v45, %v1888_v8  ;;  %v1201_v9 = vpop.f32.mrb[23].mxu1 }
 0x292   : > { %v1347_v10 = vadd.f32 %v1346_v46, %v1201_v9 }
 0x293   : > { %v1409_v11 = vadd.f32 %v2965_v48, %v1352_v33 }
 0x294   : > { %v1408_v12 = vadd.f32 %v2965_v48, %v1347_v10 }
 0x295   : > { %v1425_v13 = vmax.f32 %v1409_v11, 0.0 }
 0x296   : > { %v1424_v14 = vmax.f32 %v1408_v12, 0.0 }
 0x297   : > { %1441 = vst [vmem:[%s2971_s23 + $0x38] sm:$0xff] %v1425_v13 }
 0x298   : > { %1440 = vst [vmem:[%s2971_s23 + $0x30] sm:$0xff] %v1424_v14 }
 0x2b4   : > { %v1947_v16 = vpop.f32.mrb[24].mxu1 }
 0x2b5   : > { %v1411_v18 = vadd.f32 %v1947_v16, %v2965_v48  ;;  %v1356_v17 = vpop.f32.mrb[25].mxu1 }
 0x2b6   : > { %v1410_v32 = vadd.f32 %v2965_v48, %v1356_v17 }
 0x2b7   : > { %v1427_v19 = vmax.f32 %v1411_v18, 0.0 }
 0x2b8   : > { %v1426_v20 = vmax.f32 %v1410_v32, 0.0  ;;  %v1950_v21 = vpop.f32.mrb[26].mxu1 }
 0x2b9   : > { %1443 = vst [vmem:[%s2971_s23 + $0x48] sm:$0xff] %v1427_v19  ;;  %v1413_v22 = vadd.f32 %v1950_v21, %v2965_v48  ;;  %v1366_v23 = vpop.f32.mrb[27].mxu1 }
 0x2ba   : > { %1442 = vst [vmem:[%s2971_s23 + $0x40] sm:$0xff] %v1426_v20  ;;  %v1412_v24 = vadd.f32 %v2965_v48, %v1366_v23 }
 0x2bb   : > { %v1429_v37 = vmax.f32 %v1413_v22, 0.0 }
 0x2bc   : > { %v1428_v25 = vmax.f32 %v1412_v24, 0.0  ;;  %v1953_v27 = vpop.f32.mrb[28].mxu1 }
 0x2bd   : > { %1445 = vst [vmem:[%s2971_s23 + $0x58] sm:$0xff] %v1429_v37  ;;  %v1415_v28 = vadd.f32 %v1953_v27, %v2965_v48  ;;  %v1376_v29 = vpop.f32.mrb[29].mxu1 }
 0x2be   : > { %1444 = vst [vmem:[%s2971_s23 + $0x50] sm:$0xff] %v1428_v25  ;;  %v1414_v30 = vadd.f32 %v2965_v48, %v1376_v29 }
 0x2bf   : > { %v1431_v31 = vmax.f32 %v1415_v28, 0.0 }
 0x2c0   : > { %v1430_v51 = vmax.f32 %v1414_v30, 0.0  ;;  %v1956_v34 = vpop.f32.mrb[30].mxu1 }
 0x2c1   : > { %1447 = vst [vmem:[%s2971_s23 + $0x68] sm:$0xff] %v1431_v31  ;;  %v1417_v35 = vadd.f32 %v1956_v34, %v2965_v48  ;;  %v1386_v36 = vpop.f32.mrb[31].mxu1 }
 0x2c2   : > { %1446 = vst [vmem:[%s2971_s23 + $0x60] sm:$0xff] %v1430_v51  ;;  %v1416_v38 = vadd.f32 %v2965_v48, %v1386_v36 }
 0x2c3   : > { %v1433_v39 = vmax.f32 %v1417_v35, 0.0 }
 0x2c4   : > { %v1432_v40 = vmax.f32 %v1416_v38, 0.0 }
 0x2c5   : > { %1449 = vst [vmem:[%s2971_s23 + $0x78] sm:$0xff] %v1433_v39 }
 0x2c6   : > { %1448 = vst [vmem:[%s2971_s23 + $0x70] sm:$0xff] %v1432_v40 }
 0x2c7   : > { %2314 = shalt.err (!%p2311_p3)
}
 0x2c8   : > { %s2315_s22 = scalar_lea.hbm %s3006_s13, 2048  ;;  %s2319_s9 = scalar_lea.hbm %s3065_s7, 6144 }
 0x2c9   : > { %p2316_p4 = scmp.ne.s32.totalorder %s3006_s13, %s2315_s22  ;;  %p2320_p5 = scmp.lt.u32.totalorder %s3006_s13, %s3065_s7 }
 0x2ca   : > { %p2321_p9 = scmp.lt.u32.totalorder %s2319_s9, %s2315_s22  ;;  %p2323_p1 = scmp.lt.u32.totalorder %s2315_s22, %s3006_s13 }
 0x2cb   : > { %p2317_p13 = pnand %p2316_p4, %p2576_p11 }
 0x2cc   : > { %p2322_p12 = por %p2321_p9, %p2320_p5 }
 0x2cd   : > { %p2318_p0 = pneg %p2317_p13 }
 0x2ce   : > { %p2324_p7 = por %p2323_p1, %p2322_p12 }
 0x2d0   : > { %p2325_p2 = pnand %p2324_p7, %p2318_p0 }
 0x2d2   : > { %2328 = shalt.err (!%p2325_p2)
}
 0x2d3   : > { %s2407_s20 = smov 128   ;;  %s2408_s21 = smov 8  }
 0x2d4   : > { %2068 = dma.vmem_to_hbm [thread:$0]  (%p2576_p11), %s3008_s4, 2048, %s3006_s13, %s1451_s27, %s2407_s20, %s2407_s20, %s2408_s21  }
 0x2d5 PF: > { %s3099_s17 = sld [smem:[#allocation18_spill]]  ;;  %p2093_p6 = scmp.ge.s32.totalorder %s2395_s29, 2 }
 0x2d6   : > { %s1479_s23 = sand.u32 1, %s2375_s24  }
 0x2d7   : > { %s1480_s14 = scalar_lea.sflag [#allocation5], %s1479_s23 }
 0x2db   : > { %p3100_p8 = scmp.ne.s32.totalorder %s3099_s17, 0 }
 0x2dd   : > { %p2085_p10 = pnand %p2093_p6, %p3100_p8 }
 0x2df   : > { %2370 = dma.done.wait (!%p2085_p10), %s1480_s14, 2048  }
 0x2e0   : > { %2372 = vsyncadd (!%p2085_p10), %s1480_s14, 4294965248  ;;  %s27_s29 = sadd.s32 1, %s2395_s29   ;;  %s3101_s12 = sld [smem:[#allocation17_spill]] }
 0x2e1   : > { %p24_p3 = scmp.ge.s32.totalorder %s27_s29, 5   ;;  %s3102_s26 = sld [smem:[#allocation20_spill]] }
 0x2e2   : > { %s3103_s19 = sld [smem:[#allocation19_spill]]  ;;  %s3104_s24 = smov %s2379_s25 }
 0x2e3   : > { %s3106_s27 = smov %s2391_s28  ;;  %26 = sbr.rel (!%p24_p3) target bundleno = 13 (0xd), region = 128 }
 0x2e6   : > { %s3105_s25 = smov %s3101_s12 }
 0x2e8   : > { %s3107_s28 = smov %s3103_s19 }
 0x2ea   :  { %1485 = vsyncpa [#allocation4], 1 }
 0x2eb   :  { %1487 = vsyncpa [#allocation4 + $0x1], 1 }
 0x2ec   :  { %1488 = vsyncpa [#allocation7], 1 }
 0x2ed   :  { %1490 = vsyncpa [#allocation7 + $0x1], 1 }
 0x2ee   :  { %1491 = vsyncpa [#allocation10], 1 }
 0x2ef   :  { %1492 = vsyncpa [#allocation5], 1 }
 0x2f0   :  { %1494 = vsyncpa [#allocation5 + $0x1], 1 }

</bundles_post_ra>
